<compile_context>
chip_gen: v6e
topology: v6e:2x2x1
jax: 0.10.0
libtpu: 0.0.40
codegen_flags: <defaults>
</compile_context>

<pallas_src>
import jax
import jax.numpy as jnp
from jax.experimental import pallas as pl
from jax.experimental.pallas import tpu as pltpu


def arqrn_kernel(x_ref, w1_ref, b1_ref, w2_ref, b2_ref, o_ref):
    # x_ref: (TILE_B, F) bf16, w1_ref: (F, H) bf16, b1_ref: (1, H) f32,
    # w2_ref: (H, Qp) bf16, b2_ref: (1, Qp) f32, o_ref: (TILE_B, Qp) f32.
    x = x_ref[...]
    # fc1 + ReLU (MXU dot in bf16, f32 accumulate; bias/ReLU on VPU in f32).
    h = jnp.dot(x, w1_ref[...], preferred_element_type=jnp.float32) + b1_ref[...]
    h = jnp.maximum(h, 0.0)
    # fc2 (cast activations to bf16 for the MXU, accumulate/store in f32).
    out = jnp.dot(h.astype(w2_ref.dtype), w2_ref[...],
                  preferred_element_type=jnp.float32) + b2_ref[...]
    o_ref[...] = out  # lane-dense (Qp multiple of 128) unmasked store


def arqrn_forward(x, w1, b1, w2, b2, *, tile_b=1024, compute_dtype=jnp.bfloat16):
    """ArqRN forward: relu(x @ w1 + b1) @ w2 + b2.

    x : (B, F) f32
    w1: (F, H) f32   (transpose of PyTorch fc1.weight)
    b1: (H,)   f32
    w2: (H, Q) f32   (transpose of PyTorch fc2.weight)
    b2: (Q,)   f32
    returns (B, Q) f32
    """
    B, F = x.shape
    H = w1.shape[1]
    Q = w2.shape[1]

    # ---- lane-dense output: pad Q up to a multiple of 128 ----
    Qp = max(128, ((Q + 127) // 128) * 128)
    w2_p = jnp.pad(w2, ((0, 0), (0, Qp - Q)))
    b2_p = jnp.pad(b2.reshape(1, Q), ((0, 0), (0, Qp - Q)))
    b1_2d = b1.reshape(1, H)

    # ---- cast MXU operands to bf16 (biases / accumulators stay f32) ----
    x_c = x.astype(compute_dtype)
    w1_c = w1.astype(compute_dtype)
    w2_c = w2_p.astype(compute_dtype)

    # ---- batch tiling: TILE_B rows per grid step, pad B up to a multiple ----
    tb = min(tile_b, ((B + 7) // 8) * 8)   # multiple of 8 sublanes, <= tile_b
    Bp = ((B + tb - 1) // tb) * tb
    if Bp != B:
        x_c = jnp.pad(x_c, ((0, Bp - B), (0, 0)))
    grid = (pl.cdiv(Bp, tb),)

    out = pl.pallas_call(
        arqrn_kernel,
        out_shape=jax.ShapeDtypeStruct((Bp, Qp), jnp.float32),
        grid_spec=pltpu.PrefetchScalarGridSpec(
            num_scalar_prefetch=0,
            grid=grid,
            in_specs=[
                pl.BlockSpec((tb, F), lambda i: (i, 0)),   # streamed x tile
                pl.BlockSpec((F, H), lambda i: (0, 0)),    # VMEM-resident w1
                pl.BlockSpec((1, H), lambda i: (0, 0)),    # VMEM-resident b1
                pl.BlockSpec((H, Qp), lambda i: (0, 0)),   # VMEM-resident w2
                pl.BlockSpec((1, Qp), lambda i: (0, 0)),   # VMEM-resident b2
            ],
            out_specs=pl.BlockSpec((tb, Qp), lambda i: (i, 0)),
        ),
        compiler_params=pltpu.CompilerParams(
            dimension_semantics=("parallel",)),  # shard batch across TCs (v7x)
    )(x_c, w1_c, b1_2d, w2_c, b2_p)

    return out[:B, :Q]


def _reference(x, w1, b1, w2, b2):
    # Pure-JAX reference replicating the kernel's bf16 MXU-input numerics.
    f32 = jnp.float32
    xb = x.astype(jnp.bfloat16).astype(f32)
    w1b = w1.astype(jnp.bfloat16).astype(f32)
    w2b = w2.astype(jnp.bfloat16).astype(f32)
    h = jnp.maximum(xb @ w1b + b1, 0.0)
    hb = h.astype(jnp.bfloat16).astype(f32)
    return hb @ w2b + b2


if __name__ == "__main__":
    # Shapes implied by the module: dim_features=32, cant_neuronas=64,
    # dim_quantiles=16; small batch=8 for the demo.
    B, F, H, Q = 8, 32, 64, 16

    key = jax.random.PRNGKey(0)
    kx, kw1, kb1, kw2, kb2 = jax.random.split(key, 5)

    x = jax.random.normal(kx, (B, F), dtype=jnp.float32)
    # PyTorch shapes: fc1.weight (H,F), fc2.weight (Q,H); stored transposed.
    w1 = jax.random.normal(kw1, (F, H), dtype=jnp.float32) * 0.1
    b1 = jax.random.normal(kb1, (H,), dtype=jnp.float32) * 0.1
    w2 = jax.random.normal(kw2, (H, Q), dtype=jnp.float32) * 0.1
    b2 = jax.random.normal(kb2, (Q,), dtype=jnp.float32) * 0.1

    # Small-batch path (single grid step).
    out = jax.block_until_ready(arqrn_forward(x, w1, b1, w2, b2))
    ref = _reference(x, w1, b1, w2, b2)
    assert out.shape == (B, Q)
    assert jnp.allclose(out, ref, atol=2e-3, rtol=2e-3), \
        float(jnp.max(jnp.abs(out - ref)))

    # Exercise the gridded / padded streaming path (multiple batch tiles).
    B2 = 300
    x2 = jax.random.normal(jax.random.PRNGKey(1), (B2, F), dtype=jnp.float32)
    out2 = jax.block_until_ready(
        arqrn_forward(x2, w1, b1, w2, b2, tile_b=128))
    ref2 = _reference(x2, w1, b1, w2, b2)
    assert out2.shape == (B2, Q)
    assert jnp.allclose(out2, ref2, atol=2e-3, rtol=2e-3), \
        float(jnp.max(jnp.abs(out2 - ref2)))

    print("KERNEL_OK")
</pallas_src>

<mosaic_0001>
module attributes {stable_mosaic.version = 11 : i64} {
  func.func @arqrn_kernel(%arg0: i32, %arg1: memref<8x32xbf16, #tpu.memory_space<vmem>>, %arg2: memref<32x64xbf16, #tpu.memory_space<vmem>>, %arg3: memref<1x64xf32, #tpu.memory_space<vmem>>, %arg4: memref<64x128xbf16, #tpu.memory_space<vmem>>, %arg5: memref<1x128xf32, #tpu.memory_space<vmem>>, %arg6: memref<8x128xf32, #tpu.memory_space<vmem>>) attributes {dimension_semantics = [#tpu.dimension_semantics<parallel>], iteration_bounds = array<i64: 1>, scalar_prefetch = 0 : i64, scratch_operands = 0 : i64, tpu.core_type = #tpu.core_type<tc>, window_params = [{transform_indices = @transform_0, window_bounds = array<i64: 8, 32>}, {pipeline_mode = #tpu.pipeline_mode<synchronous>, transform_indices = @transform_1, window_bounds = array<i64: 32, 64>}, {pipeline_mode = #tpu.pipeline_mode<synchronous>, transform_indices = @transform_2, window_bounds = array<i64: 1, 64>}, {pipeline_mode = #tpu.pipeline_mode<synchronous>, transform_indices = @transform_3, window_bounds = array<i64: 64, 128>}, {pipeline_mode = #tpu.pipeline_mode<synchronous>, transform_indices = @transform_4, window_bounds = array<i64: 1, 128>}, {transform_indices = @transform_5, window_bounds = array<i64: 8, 128>}]} {
    %c0 = arith.constant 0 : index
    %c0_0 = arith.constant 0 : index
    %0 = vector.load %arg1[%c0, %c0_0] : memref<8x32xbf16, #tpu.memory_space<vmem>>, vector<8x32xbf16>
    %c0_1 = arith.constant 0 : index
    %c0_2 = arith.constant 0 : index
    %1 = vector.load %arg2[%c0_1, %c0_2] : memref<32x64xbf16, #tpu.memory_space<vmem>>, vector<32x64xbf16>
    %cst = arith.constant dense<0.000000e+00> : vector<8x64xf32>
    %2 = tpu.matmul %0, %1, %cst {dimension_numbers = #tpu.dot_dimension_numbers<[1], [0], [0], [1], [0, 0, 1, 1], [], []>} : vector<8x32xbf16>, vector<32x64xbf16>, vector<8x64xf32> -> vector<8x64xf32>
    %c0_3 = arith.constant 0 : index
    %c0_4 = arith.constant 0 : index
    %3 = vector.load %arg3[%c0_3, %c0_4] : memref<1x64xf32, #tpu.memory_space<vmem>>, vector<1x64xf32>
    %4 = vector.broadcast %3 : vector<1x64xf32> to vector<8x64xf32>
    %5 = arith.addf %2, %4 : vector<8x64xf32>
    %cst_5 = arith.constant 0.000000e+00 : f32
    %6 = vector.broadcast %cst_5 : f32 to vector<8x64xf32>
    %7 = arith.maximumf %5, %6 : vector<8x64xf32>
    %8 = arith.truncf %7 : vector<8x64xf32> to vector<8x64xbf16>
    %c0_6 = arith.constant 0 : index
    %c0_7 = arith.constant 0 : index
    %9 = vector.load %arg4[%c0_6, %c0_7] : memref<64x128xbf16, #tpu.memory_space<vmem>>, vector<64x128xbf16>
    %cst_8 = arith.constant dense<0.000000e+00> : vector<8x128xf32>
    %10 = tpu.matmul %8, %9, %cst_8 {dimension_numbers = #tpu.dot_dimension_numbers<[1], [0], [0], [1], [0, 0, 1, 1], [], []>} : vector<8x64xbf16>, vector<64x128xbf16>, vector<8x128xf32> -> vector<8x128xf32>
    %c0_9 = arith.constant 0 : index
    %c0_10 = arith.constant 0 : index
    %11 = vector.load %arg5[%c0_9, %c0_10] : memref<1x128xf32, #tpu.memory_space<vmem>>, vector<1x128xf32>
    %12 = vector.broadcast %11 : vector<1x128xf32> to vector<8x128xf32>
    %13 = arith.addf %10, %12 : vector<8x128xf32>
    %c0_11 = arith.constant 0 : index
    %c0_12 = arith.constant 0 : index
    %14 = vector.load %arg6[%c0_11, %c0_12] : memref<8x128xf32, #tpu.memory_space<vmem>>, vector<8x128xf32>
    tpu.vector_store %arg6[%c0_11, %c0_12], %13 {strides = array<i32>} : memref<8x128xf32, #tpu.memory_space<vmem>>, vector<8x128xf32>,
    return
  }
  func.func @transform_0(%arg0: i32) -> (i32, i32) {
    %c0_i32 = arith.constant 0 : i32
    %c0_i32_0 = arith.constant 0 : i32
    return %arg0, %c0_i32 : i32, i32
  }
  func.func @transform_1(%arg0: i32) -> (i32, i32) {
    %c0_i32 = arith.constant 0 : i32
    %c0_i32_0 = arith.constant 0 : i32
    %c0_i32_1 = arith.constant 0 : i32
    return %c0_i32, %c0_i32_0 : i32, i32
  }
  func.func @transform_2(%arg0: i32) -> (i32, i32) {
    %c0_i32 = arith.constant 0 : i32
    %c0_i32_0 = arith.constant 0 : i32
    %c0_i32_1 = arith.constant 0 : i32
    return %c0_i32, %c0_i32_0 : i32, i32
  }
  func.func @transform_3(%arg0: i32) -> (i32, i32) {
    %c0_i32 = arith.constant 0 : i32
    %c0_i32_0 = arith.constant 0 : i32
    %c0_i32_1 = arith.constant 0 : i32
    return %c0_i32, %c0_i32_0 : i32, i32
  }
  func.func @transform_4(%arg0: i32) -> (i32, i32) {
    %c0_i32 = arith.constant 0 : i32
    %c0_i32_0 = arith.constant 0 : i32
    %c0_i32_1 = arith.constant 0 : i32
    return %c0_i32, %c0_i32_0 : i32, i32
  }
  func.func @transform_5(%arg0: i32) -> (i32, i32) {
    %c0_i32 = arith.constant 0 : i32
    %c0_i32_0 = arith.constant 0 : i32
    return %arg0, %c0_i32 : i32, i32
  }
}

</mosaic_0001>

<bundles_post_ra>
// kernel: tpu_custom_call.1
= control target key start
LH: loop header
LB: loop body
LE: loop exit
PB: predicated region body
PF: predicated region fallthrough
CT: control target
= control target key end

     0   :  { %10 = vsyncpa [#allocation3], 0  ;;  %s425_s0 = inlined_call_operand.hbm [shape: bf16[8,32], index: 0, kind: input, shape index: {}]   ;;  %s426_s1 = inlined_call_operand.hbm [shape: bf16[32,64], index: 1, kind: input, shape index: {}]   ;;  %s427_s2 = inlined_call_operand.vmem [shape: f32[1,64], index: 2, kind: input, shape index: {}]   ;;  %s428_s3 = inlined_call_operand.hbm [shape: bf16[64,128], index: 3, kind: input, shape index: {}]   ;;  %s429_s4 = inlined_call_operand.vmem [shape: f32[1,128], index: 4, kind: input, shape index: {}]   ;;  %s430_s5 = inlined_call_operand.hbm [shape: f32[8,128], index: 5, kind: output, shape index: {}]  }
   0x1   :  { %11 = vsyncpa [#allocation6], 0 }
   0x2   :  { %12 = vsyncpa [#allocation4], 0  ;;  %s369_s18 = smov [#allocation5]  }
   0x3   :  { %s28_s19 = sshll.u32 %s369_s18, 4  ;;  %s29_s19 = int_to_ptr.vmem [resolvable:$true] %s28_s19 }
   0x4   :  { %s291_s20 = scalar_lea.vmem %s29_s19, 256  ;;  %p296_p1 = scmp.lt.s32.totalorder %s29_s19, %s29_s19 }
   0x5   :  { %p292_p0 = scmp.ne.s32.totalorder %s29_s19, %s291_s20  ;;  %p297_p2 = scmp.lt.s32.totalorder %s291_s20, %s291_s20 }
   0x7   :  { %p298_p3 = por %p297_p2, %p296_p1 }
   0x9   :  { %p299_p4 = pnand %p298_p3, %p292_p0 }
   0xb   :  { %302 = shalt.err (!%p299_p4)
}
   0xc   :  { %s370_s21 = smov 64   ;;  %s371_s22 = smov 4  }
   0xd   :  { %34 = dma.hbm_to_vmem [thread:$0]  %s426_s1, 256, %s29_s19, [#allocation6], %s370_s21, %s370_s21, %s371_s22  }
   0xe   :  { %s372_s25 = smov [#allocation2]   ;;  %s373_s27 = smov [#allocation7]  }
   0xf   :  { %s19_s26 = sshll.u32 %s372_s25, 4  ;;  %s42_s28 = sshll.u32 %s373_s27, 4  ;;  %s20_s26 = int_to_ptr.vmem [resolvable:$true] %s19_s26  ;;  %s43_s28 = int_to_ptr.vmem [resolvable:$true] %s42_s28 }
  0x10   :  { %s311_s29 = scalar_lea.vmem %s20_s26, 64  ;;  %p316_p6 = scmp.lt.s32.totalorder %s20_s26, %s20_s26 }
  0x11   :  { %p312_p5 = scmp.ne.s32.totalorder %s20_s26, %s311_s29  ;;  %p317_p7 = scmp.lt.s32.totalorder %s311_s29, %s311_s29 }
  0x13   :  { %p318_p8 = por %p317_p7, %p316_p6 }
  0x15   :  { %p319_p9 = pnand %p318_p8, %p312_p5 }
  0x17   :  { %322 = shalt.err (!%p319_p9)
}
  0x18   :  { %22 = dma.hbm_to_vmem [thread:$0]  %s425_s0, 64, %s20_s26, [#allocation3]  }
  0x19   :  { %s331_s7 = scalar_lea.vmem %s43_s28, 512  ;;  %p336_p11 = scmp.lt.s32.totalorder %s43_s28, %s43_s28 }
  0x1a   :  { %p332_p10 = scmp.ne.s32.totalorder %s43_s28, %s331_s7  ;;  %p337_p12 = scmp.lt.s32.totalorder %s331_s7, %s331_s7 }
  0x1c   :  { %p338_p13 = por %p337_p12, %p336_p11 }
  0x1e   :  { %p339_p0 = pnand %p338_p13, %p332_p10 }
  0x20   :  { %342 = shalt.err (!%p339_p0)
}
  0x21   :  { %48 = dma.hbm_to_vmem [thread:$0]  %s428_s3, 512, %s43_s28, [#allocation6], %s370_s21, %s370_s21, %s371_s22  }
  0x22   :  { %363 = dma.done.wait [#allocation3], 64  }
  0x23   :  { %364 = vsyncadd [#allocation3], 4294967232 }
  0x24   :  { %365 = dma.done.wait [#allocation6], 768  }
  0x25   :  { %366 = vsyncadd [#allocation6], 4294966528  ;;  %v374_v0 = vmov 0.0   ;;  %vm375_vm0 = vmmov 0   ;;  %v277_v1 = vld [vmem:[#allocation5 + $0x8] sm:$0xff]   ;;  %v278_v2 = vld [vmem:[#allocation5] sm:$0xff]  }
  0x26   :  { %249 = vmatprep.subr.bf16.mxu0 %v374_v0  ;;  %253 = vmatprep.mubr.msk.bf16.mxu0 %vm375_vm0, %v374_v0  ;;  %v279_v3 = vld [vmem:[#allocation7 + $0x18] sm:$0xff]   ;;  %v280_v4 = vld [vmem:[#allocation7 + $0x10] sm:$0xff]   ;;  %v61_v5 = vld [vmem:[#allocation2] sm:$0xf]  ;;  %vm85_vm1 = vcmask 261120   ;;  %vm170_vm2 = vcmask 523264  }
  0x27   :  { %257 = vmatprep.subr.bf16.mxu1 %v374_v0  ;;  %265 = vmatprep.mubr.msk.bf16.mxu1 %vm375_vm0, %v374_v0  ;;  %v281_v6 = vld [vmem:[#allocation7 + $0x8] sm:$0xff]   ;;  %v282_v7 = vld [vmem:[#allocation7] sm:$0xff]   ;;  %s376_s11 = smov [#allocation8]  }
  0x28   :  { %250 = vmatpush3.bf16.msra.mxu0 %v277_v1  ;;  %258 = vmatpush3.bf16.msra.mxu1 %v279_v3  ;;  %v231_v8 = vld [vmem:[%s427_s2] ss:$0 sm:$0xff]  ;;  %s221_s12 = sshll.u32 %s376_s11, 4  ;;  %s222_s12 = int_to_ptr.vmem [resolvable:$true] %s221_s12 }
  0x29   :  { %251 = vmatprep.subr.bf16.mxu0 %v374_v0  ;;  %259 = vmatprep.subr.bf16.mxu1 %v374_v0  ;;  %v235_v16 = vld [vmem:[%s429_s4] ss:$0 sm:$0xff]  ;;  %s343_s2 = scalar_lea.vmem %s222_s12, 128  ;;  %p348_p2 = scmp.lt.s32.totalorder %s222_s12, %s222_s12 }
  0x2a   :  { %p344_p1 = scmp.ne.s32.totalorder %s222_s12, %s343_s2  ;;  %p349_p3 = scmp.lt.s32.totalorder %s343_s2, %s343_s2 }
  0x2c   :  { %252 = vmatpush3.bf16.msra.mxu0 %v278_v2  ;;  %260 = vmatpush3.bf16.msra.mxu1 %v280_v4  ;;  %p350_p4 = por %p349_p3, %p348_p2 }
  0x2d   :  { %261 = vmatprep.subr.bf16.mxu1 %v374_v0 }
  0x2e   :  { %p351_p5 = pnand %p350_p4, %p344_p1 }
  0x2f   :  { %254 = vmatmul.mubr.msk.bf16.vlgmr.msra.gmra.mxu0 %vm85_vm1, %v61_v5 }
  0x30   :  { %262 = vmatpush3.bf16.msra.mxu1 %v281_v6 }
  0x31   :  { %263 = vmatprep.subr.bf16.mxu1 %v374_v0 }
  0x34   :  { %264 = vmatpush3.bf16.msra.mxu1 %v282_v7 }
  0xef   :  { %v123_v9 = vpop.f32.mrf.mxu0 }
  0xf0   :  { %v124_v10 = vadd.f32 %v231_v8, %v123_v9 }
  0xf1   :  { %v255_v11 = vpop.f32.mrf.mxu0 }
  0xf2   :  { %v129_v12 = vmax.f32 %v124_v10, 0.0 }
  0xf3   :  { %v126_v13 = vpop.f32.mrf.mxu0 }
  0xf4   :  { %v130_v14 = vpack.c.bf16 %v129_v12, %v129_v12 }
  0xf5   :  { %v256_v15 = vpop.f32.mrf.mxu0 }
  0xf6   :  { %266 = vmatmul.mubr.msk.bf16.vlgmr.msra.gmra.mxu1 %vm170_vm2, %v130_v14 }
 0x1b6   :  { %v208_v17 = vpop.f32.mrf.mxu1 }
 0x1b7   :  { %v209_v18 = vadd.f32 %v235_v16, %v208_v17 }
 0x1b8   :  { %v267_v19 = vpop.f32.mrf.mxu1 }
 0x1b9   :  { %214 = vst [vmem:[#allocation8] sm:$0xff] %v209_v18 }
 0x1ba   :  { %v211_v20 = vpop.f32.mrf.mxu1 }
 0x1bb   :  { %354 = shalt.err (!%p351_p5)
}
 0x1bc   :  { %224 = dma.vmem_to_hbm [thread:$0]  %s222_s12, 128, %s430_s5, [#allocation4]   ;;  %v268_v21 = vpop.f32.mrf.mxu1 }
 0x1bd   :  { %367 = dma.done.wait [#allocation4], 128  }
 0x1be   :  { %368 = vsyncadd [#allocation4], 4294967168 }
 0x1bf   :  { %228 = vsyncpa [#allocation3], 1 }
 0x1c0   :  { %229 = vsyncpa [#allocation6], 1 }
 0x1c1   :  { %230 = vsyncpa [#allocation4], 1 }

</bundles_post_ra>
